<compile_context>
chip_gen: v7x
topology: tpu7x:2x2x1
jax: 0.10.0
libtpu: 0.0.40
codegen_flags: <defaults>
</compile_context>

<pallas_src>
import jax
import jax.numpy as jnp
from jax.experimental import pallas as pl
from jax.experimental.pallas import tpu as pltpu

NUM_JOINTS = 14
BN_EPS = 1e-5
COUTS = (32, 64, 128)   # static per-layer output channels
NP_OUT = 128            # lane-dense conv output channel padding
K_ALIGN = 16            # bf16 sublane pack for the resident weight block


def _round_up(x, m):
    return (x + m - 1) // m * m


def _pick_tm(M):
    """Single M tile for small problems; 1024-row tiles (>=2 tiles, megacore
    shardable on v7x) once M exceeds 1024."""
    m8 = _round_up(M, 8)
    return m8 if m8 <= 1024 else 1024


# ----------------------------- Pallas kernels -------------------------------

def conv_bn_relu_kernel(p_ref, w_ref, b_ref, o_ref):
    # p: (tm, Kp) bf16 im2col patches
    # w: (Kp, 128) bf16 BN-folded weights -- block index is constant over the
    #    grid, so the tile is DMA'd once and stays resident in VMEM.
    # b: (1, 128) f32 folded bias, o: (tm, 128) bf16.
    acc = jnp.dot(p_ref[...], w_ref[...], preferred_element_type=jnp.float32)
    o_ref[...] = jnp.maximum(acc + b_ref[...], 0.0).astype(o_ref.dtype)


def conv_bn_relu(patches, w, bias, *, tm):
    Mp, Kp = patches.shape
    Kw, Np = w.shape
    assert Kw == Kp and Mp % tm == 0, (patches.shape, w.shape, tm)
    return pl.pallas_call(
        conv_bn_relu_kernel,
        out_shape=jax.ShapeDtypeStruct((Mp, Np), jnp.bfloat16),
        grid_spec=pltpu.PrefetchScalarGridSpec(
            num_scalar_prefetch=0,
            grid=(Mp // tm,),                                  # M only; K resident
            in_specs=[
                pl.BlockSpec((tm, Kp), lambda i: (i, 0)),      # patches tile
                pl.BlockSpec((Kp, Np), lambda i: (0, 0)),      # resident weights
                pl.BlockSpec((1, Np), lambda i: (0, 0)),       # resident bias
            ],
            out_specs=pl.BlockSpec((tm, Np), lambda i: (i, 0)),
        ),
        compiler_params=pltpu.CompilerParams(
            dimension_semantics=("parallel",),
            # ~3 MB working set at tm=1024, Kp=576 -> ample on v5e/v6e/v7x.
            vmem_limit_bytes=32 * 1024 * 1024,
        ),
    )(patches, w, bias)


def pool_fc_kernel(x_ref, w_ref, b_ref, o_ref):
    # x: (B, S, 128) bf16 last-conv activations; pool over S in f32, then FC.
    pooled = jnp.mean(x_ref[...].astype(jnp.float32), axis=1)          # (B, 128)
    o_ref[...] = jnp.dot(pooled.astype(jnp.bfloat16), w_ref[...],
                         preferred_element_type=jnp.float32) + b_ref[...]


def pool_fc(x, w, b):
    B, S, C = x.shape
    _, N = w.shape   # N padded to 128 (lane dense)
    return pl.pallas_call(
        pool_fc_kernel,
        out_shape=jax.ShapeDtypeStruct((B, N), jnp.float32),
        grid=(1,),
        in_specs=[
            pl.BlockSpec((B, S, C), lambda i: (0, 0, 0)),
            pl.BlockSpec((C, N), lambda i: (0, 0)),
            pl.BlockSpec((1, N), lambda i: (0, 0)),
        ],
        out_specs=pl.BlockSpec((B, N), lambda i: (0, 0)),
        compiler_params=pltpu.CompilerParams(
            dimension_semantics=("arbitrary",),
            vmem_limit_bytes=32 * 1024 * 1024,
        ),
    )(x, w, b)


# ------------------------------ JAX glue -------------------------------------

def im2col(x, *, k=3, stride=2, pad=1):
    """x: (B, H, W, C) -> patches (B*Ho*Wo, k*k*C) ordered (kh, kw, cin)."""
    B, H, W, C = x.shape
    xp = jnp.pad(x, ((0, 0), (pad, pad), (pad, pad), (0, 0)))
    Ho = (H + 2 * pad - k) // stride + 1
    Wo = (W + 2 * pad - k) // stride + 1
    cols = []
    for kh in range(k):
        for kw in range(k):
            cols.append(xp[:, kh:kh + stride * Ho:stride,
                           kw:kw + stride * Wo:stride, :])
    patches = jnp.stack(cols, axis=3)          # (B, Ho, Wo, 9, C)
    return patches.reshape(B * Ho * Wo, k * k * C), Ho, Wo


def fold_bn_into_weights(w, conv_bias, gamma, beta, running_mean, running_var):
    """Fold conv bias + inference BatchNorm into weights and a per-channel bias.

    w: (3, 3, Cin, Cout) -> ((9*Cin, Cout) folded weights, (Cout,) bias).
    """
    scale = gamma / jnp.sqrt(running_var + BN_EPS)            # (Cout,)
    w_folded = (w * scale).reshape(-1, w.shape[-1])           # per-Cout scale
    bias = (conv_bias - running_mean) * scale + beta
    return w_folded, bias


def init_params(key):
    params = {}
    cins = [3 + NUM_JOINTS, 32, 64]
    for li, (cin, cout) in enumerate(zip(cins, COUTS), start=1):
        key, k_w, k_b, k_g, k_be, k_m, k_v = jax.random.split(key, 7)
        w = jax.random.normal(k_w, (3, 3, cin, cout), jnp.float32) * 0.05
        b = jax.random.normal(k_b, (cout,), jnp.float32) * 0.05
        gamma = 1.0 + 0.1 * jax.random.normal(k_g, (cout,), jnp.float32)
        beta = 0.1 * jax.random.normal(k_be, (cout,), jnp.float32)
        rmean = 0.05 * jax.random.normal(k_m, (cout,), jnp.float32)
        rvar = 1.0 + 0.1 * jnp.abs(jax.random.normal(k_v, (cout,), jnp.float32))
        w_folded, bias = fold_bn_into_weights(w, b, gamma, beta, rmean, rvar)
        K = w_folded.shape[0]                   # 9 * Cin
        Kp = _round_up(K, K_ALIGN)              # minimal K pad (bf16 sublane pack)
        Np = NP_OUT                             # lane-dense output dim (128)
        w_pad = jnp.zeros((Kp, Np), jnp.float32).at[:K, :cout].set(w_folded)
        b_pad = jnp.zeros((1, Np), jnp.float32).at[0, :cout].set(bias)
        params[f"l{li}"] = (w_pad.astype(jnp.bfloat16), b_pad)
    key, k_fw, k_fb = jax.random.split(key, 3)
    fc_w = jax.random.normal(k_fw, (128, NUM_JOINTS * 3), jnp.float32) * 0.05
    fc_b = jax.random.normal(k_fb, (NUM_JOINTS * 3,), jnp.float32) * 0.05
    Nfc = _round_up(NUM_JOINTS * 3, 128)        # 128, lane-dense FC output
    fc_w_pad = jnp.zeros((128, Nfc), jnp.float32).at[:, :NUM_JOINTS * 3].set(fc_w)
    params["fc_w"] = fc_w_pad.astype(jnp.bfloat16)   # halve FC weight DMA
    params["fc_b"] = jnp.zeros((1, Nfc), jnp.float32).at[0, :NUM_JOINTS * 3].set(fc_b)
    return params


@jax.jit
def modified_selecsls_forward(params, x_image, x_heatmaps):
    # x_image: (B, 3, H, W), x_heatmaps: (B, 14, H, W)  -- NCHW like PyTorch.
    x = jnp.concatenate([x_image, x_heatmaps], axis=1)         # (B, 17, H, W)
    x = jnp.transpose(x, (0, 2, 3, 1)).astype(jnp.bfloat16)    # NHWC, bf16 acts
    B = x.shape[0]
    for li, cout in enumerate(COUTS, start=1):
        w, bias = params[f"l{li}"]
        patches, Ho, Wo = im2col(x)                            # (M, K) bf16
        M, K = patches.shape
        Kp = w.shape[0]
        tm = _pick_tm(M)                                       # computed once here
        Mp = _round_up(M, tm)
        # One pad for both the small K alignment and the M-tile remainder;
        # XLA fuses it into the im2col gather fusion (no extra HBM pass).
        if (Mp, Kp) != (M, K):
            patches = jnp.pad(patches, ((0, Mp - M), (0, Kp - K)))
        y = conv_bn_relu(patches, w, bias, tm=tm)              # (Mp, 128) bf16
        x = y[:M, :cout].reshape(B, Ho, Wo, cout)
    x3 = x.reshape(B, x.shape[1] * x.shape[2], x.shape[3])     # (B, S, 128)
    out = pool_fc(x3, params["fc_w"], params["fc_b"])          # (B, 128) padded f32
    out = out[:, :NUM_JOINTS * 3]                              # (B, 42)
    return out.reshape(-1, 3, NUM_JOINTS)                      # (B, 3, 14)


# ------------------------------ main ------------------------------------------

if __name__ == "__main__":
    key = jax.random.PRNGKey(0)
    k_params, k_img, k_hm = jax.random.split(key, 3)

    params = init_params(k_params)

    B, H, W = 2, 16, 16
    x_image = jax.random.normal(k_img, (B, 3, H, W), jnp.float32)
    x_heatmaps = jax.random.normal(k_hm, (B, NUM_JOINTS, H, W), jnp.float32)

    out = modified_selecsls_forward(params, x_image, x_heatmaps)
    out = jax.block_until_ready(out)
    assert out.shape == (B, 3, NUM_JOINTS), out.shape
    assert bool(jnp.all(jnp.isfinite(out)))
    print("KERNEL_OK")
</pallas_src>

<mosaic_0001>
module attributes {stable_mosaic.version = 11 : i64} {
  func.func @conv_bn_relu_kernel(%arg0: i32, %arg1: memref<128x160xbf16, #tpu.memory_space<vmem>>, %arg2: memref<160x128xbf16, #tpu.memory_space<vmem>>, %arg3: memref<1x128xf32, #tpu.memory_space<vmem>>, %arg4: memref<128x128xbf16, #tpu.memory_space<vmem>>) attributes {dimension_semantics = [#tpu.dimension_semantics<parallel>], iteration_bounds = array<i64: 1>, scalar_prefetch = 0 : i64, scratch_operands = 0 : i64, tpu.core_type = #tpu.core_type<tc>, window_params = [{transform_indices = @transform_0, window_bounds = array<i64: 128, 160>}, {pipeline_mode = #tpu.pipeline_mode<synchronous>, transform_indices = @transform_1, window_bounds = array<i64: 160, 128>}, {pipeline_mode = #tpu.pipeline_mode<synchronous>, transform_indices = @transform_2, window_bounds = array<i64: 1, 128>}, {transform_indices = @transform_3, window_bounds = array<i64: 128, 128>}]} {
    %c0 = arith.constant 0 : index
    %c0_0 = arith.constant 0 : index
    %0 = vector.load %arg1[%c0, %c0_0] : memref<128x160xbf16, #tpu.memory_space<vmem>>, vector<128x160xbf16>
    %c0_1 = arith.constant 0 : index
    %c0_2 = arith.constant 0 : index
    %1 = vector.load %arg2[%c0_1, %c0_2] : memref<160x128xbf16, #tpu.memory_space<vmem>>, vector<160x128xbf16>
    %cst = arith.constant dense<0.000000e+00> : vector<128x128xf32>
    %2 = tpu.matmul %0, %1, %cst {dimension_numbers = #tpu.dot_dimension_numbers<[1], [0], [0], [1], [0, 0, 1, 1], [], []>} : vector<128x160xbf16>, vector<160x128xbf16>, vector<128x128xf32> -> vector<128x128xf32>
    %c0_3 = arith.constant 0 : index
    %c0_4 = arith.constant 0 : index
    %3 = vector.load %arg3[%c0_3, %c0_4] : memref<1x128xf32, #tpu.memory_space<vmem>>, vector<1x128xf32>
    %4 = vector.broadcast %3 : vector<1x128xf32> to vector<128x128xf32>
    %5 = arith.addf %2, %4 : vector<128x128xf32>
    %cst_5 = arith.constant 0.000000e+00 : f32
    %6 = vector.broadcast %cst_5 : f32 to vector<128x128xf32>
    %7 = arith.maximumf %5, %6 : vector<128x128xf32>
    %8 = arith.truncf %7 : vector<128x128xf32> to vector<128x128xbf16>
    %c0_6 = arith.constant 0 : index
    %c0_7 = arith.constant 0 : index
    %9 = vector.load %arg4[%c0_6, %c0_7] : memref<128x128xbf16, #tpu.memory_space<vmem>>, vector<128x128xbf16>
    tpu.vector_store %arg4[%c0_6, %c0_7], %8 {strides = array<i32>} : memref<128x128xbf16, #tpu.memory_space<vmem>>, vector<128x128xbf16>,
    return
  }
  func.func @transform_0(%arg0: i32) -> (i32, i32) {
    %c0_i32 = arith.constant 0 : i32
    %c0_i32_0 = arith.constant 0 : i32
    return %arg0, %c0_i32 : i32, i32
  }
  func.func @transform_1(%arg0: i32) -> (i32, i32) {
    %c0_i32 = arith.constant 0 : i32
    %c0_i32_0 = arith.constant 0 : i32
    %c0_i32_1 = arith.constant 0 : i32
    return %c0_i32, %c0_i32_0 : i32, i32
  }
  func.func @transform_2(%arg0: i32) -> (i32, i32) {
    %c0_i32 = arith.constant 0 : i32
    %c0_i32_0 = arith.constant 0 : i32
    %c0_i32_1 = arith.constant 0 : i32
    return %c0_i32, %c0_i32_0 : i32, i32
  }
  func.func @transform_3(%arg0: i32) -> (i32, i32) {
    %c0_i32 = arith.constant 0 : i32
    %c0_i32_0 = arith.constant 0 : i32
    return %arg0, %c0_i32 : i32, i32
  }
}

module attributes {stable_mosaic.version = 11 : i64} {
  func.func @conv_bn_relu_kernel(%arg0: i32, %arg1: memref<32x288xbf16, #tpu.memory_space<vmem>>, %arg2: memref<288x128xbf16, #tpu.memory_space<vmem>>, %arg3: memref<1x128xf32, #tpu.memory_space<vmem>>, %arg4: memref<32x128xbf16, #tpu.memory_space<vmem>>) attributes {dimension_semantics = [#tpu.dimension_semantics<parallel>], iteration_bounds = array<i64: 1>, scalar_prefetch = 0 : i64, scratch_operands = 0 : i64, tpu.core_type = #tpu.core_type<tc>, window_params = [{transform_indices = @transform_0, window_bounds = array<i64: 32, 288>}, {pipeline_mode = #tpu.pipeline_mode<synchronous>, transform_indices = @transform_1, window_bounds = array<i64: 288, 128>}, {pipeline_mode = #tpu.pipeline_mode<synchronous>, transform_indices = @transform_2, window_bounds = array<i64: 1, 128>}, {transform_indices = @transform_3, window_bounds = array<i64: 32, 128>}]} {
    %c0 = arith.constant 0 : index
    %c0_0 = arith.constant 0 : index
    %0 = vector.load %arg1[%c0, %c0_0] : memref<32x288xbf16, #tpu.memory_space<vmem>>, vector<32x288xbf16>
    %c0_1 = arith.constant 0 : index
    %c0_2 = arith.constant 0 : index
    %1 = vector.load %arg2[%c0_1, %c0_2] : memref<288x128xbf16, #tpu.memory_space<vmem>>, vector<288x128xbf16>
    %cst = arith.constant dense<0.000000e+00> : vector<32x128xf32>
    %2 = tpu.matmul %0, %1, %cst {dimension_numbers = #tpu.dot_dimension_numbers<[1], [0], [0], [1], [0, 0, 1, 1], [], []>} : vector<32x288xbf16>, vector<288x128xbf16>, vector<32x128xf32> -> vector<32x128xf32>
    %c0_3 = arith.constant 0 : index
    %c0_4 = arith.constant 0 : index
    %3 = vector.load %arg3[%c0_3, %c0_4] : memref<1x128xf32, #tpu.memory_space<vmem>>, vector<1x128xf32>
    %4 = vector.broadcast %3 : vector<1x128xf32> to vector<32x128xf32>
    %5 = arith.addf %2, %4 : vector<32x128xf32>
    %cst_5 = arith.constant 0.000000e+00 : f32
    %6 = vector.broadcast %cst_5 : f32 to vector<32x128xf32>
    %7 = arith.maximumf %5, %6 : vector<32x128xf32>
    %8 = arith.truncf %7 : vector<32x128xf32> to vector<32x128xbf16>
    %c0_6 = arith.constant 0 : index
    %c0_7 = arith.constant 0 : index
    %9 = vector.load %arg4[%c0_6, %c0_7] : memref<32x128xbf16, #tpu.memory_space<vmem>>, vector<32x128xbf16>
    tpu.vector_store %arg4[%c0_6, %c0_7], %8 {strides = array<i32>} : memref<32x128xbf16, #tpu.memory_space<vmem>>, vector<32x128xbf16>,
    return
  }
  func.func @transform_0(%arg0: i32) -> (i32, i32) {
    %c0_i32 = arith.constant 0 : i32
    %c0_i32_0 = arith.constant 0 : i32
    return %arg0, %c0_i32 : i32, i32
  }
  func.func @transform_1(%arg0: i32) -> (i32, i32) {
    %c0_i32 = arith.constant 0 : i32
    %c0_i32_0 = arith.constant 0 : i32
    %c0_i32_1 = arith.constant 0 : i32
    return %c0_i32, %c0_i32_0 : i32, i32
  }
  func.func @transform_2(%arg0: i32) -> (i32, i32) {
    %c0_i32 = arith.constant 0 : i32
    %c0_i32_0 = arith.constant 0 : i32
    %c0_i32_1 = arith.constant 0 : i32
    return %c0_i32, %c0_i32_0 : i32, i32
  }
  func.func @transform_3(%arg0: i32) -> (i32, i32) {
    %c0_i32 = arith.constant 0 : i32
    %c0_i32_0 = arith.constant 0 : i32
    return %arg0, %c0_i32 : i32, i32
  }
}

module attributes {stable_mosaic.version = 11 : i64} {
  func.func @pool_fc_kernel(%arg0: i32, %arg1: memref<2x4x128xbf16, #tpu.memory_space<vmem>>, %arg2: memref<128x128xbf16, #tpu.memory_space<vmem>>, %arg3: memref<1x128xf32, #tpu.memory_space<vmem>>, %arg4: memref<2x128xf32, #tpu.memory_space<vmem>>) attributes {dimension_semantics = [#tpu.dimension_semantics<arbitrary>], iteration_bounds = array<i64: 1>, scalar_prefetch = 0 : i64, scratch_operands = 0 : i64, tpu.core_type = #tpu.core_type<tc>, window_params = [{pipeline_mode = #tpu.pipeline_mode<synchronous>, transform_indices = @transform_0, window_bounds = array<i64: 2, 4, 128>}, {pipeline_mode = #tpu.pipeline_mode<synchronous>, transform_indices = @transform_1, window_bounds = array<i64: 128, 128>}, {pipeline_mode = #tpu.pipeline_mode<synchronous>, transform_indices = @transform_2, window_bounds = array<i64: 1, 128>}, {pipeline_mode = #tpu.pipeline_mode<synchronous>, transform_indices = @transform_3, window_bounds = array<i64: 2, 128>}]} {
    %c0 = arith.constant 0 : index
    %c0_0 = arith.constant 0 : index
    %c0_1 = arith.constant 0 : index
    %0 = vector.load %arg1[%c0, %c0_0, %c0_1] : memref<2x4x128xbf16, #tpu.memory_space<vmem>>, vector<2x4x128xbf16>
    %1 = arith.extf %0 : vector<2x4x128xbf16> to vector<2x4x128xf32>
    %cst = arith.constant dense<0.000000e+00> : vector<2x128xf32>
    %2 = vector.multi_reduction <add>, %1, %cst [1] : vector<2x4x128xf32> to vector<2x128xf32>
    %cst_2 = arith.constant 4.000000e+00 : f32
    %3 = vector.broadcast %cst_2 : f32 to vector<2x128xf32>
    %4 = arith.divf %2, %3 : vector<2x128xf32>
    %5 = arith.truncf %4 : vector<2x128xf32> to vector<2x128xbf16>
    %c0_3 = arith.constant 0 : index
    %c0_4 = arith.constant 0 : index
    %6 = vector.load %arg2[%c0_3, %c0_4] : memref<128x128xbf16, #tpu.memory_space<vmem>>, vector<128x128xbf16>
    %cst_5 = arith.constant dense<0.000000e+00> : vector<2x128xf32>
    %7 = tpu.matmul %5, %6, %cst_5 {dimension_numbers = #tpu.dot_dimension_numbers<[1], [0], [0], [1], [0, 0, 1, 1], [], []>} : vector<2x128xbf16>, vector<128x128xbf16>, vector<2x128xf32> -> vector<2x128xf32>
    %c0_6 = arith.constant 0 : index
    %c0_7 = arith.constant 0 : index
    %8 = vector.load %arg3[%c0_6, %c0_7] : memref<1x128xf32, #tpu.memory_space<vmem>>, vector<1x128xf32>
    %9 = vector.broadcast %8 : vector<1x128xf32> to vector<2x128xf32>
    %10 = arith.addf %7, %9 : vector<2x128xf32>
    %c0_8 = arith.constant 0 : index
    %c0_9 = arith.constant 0 : index
    %11 = vector.load %arg4[%c0_8, %c0_9] : memref<2x128xf32, #tpu.memory_space<vmem>>, vector<2x128xf32>
    tpu.vector_store %arg4[%c0_8, %c0_9], %10 {strides = array<i32>} : memref<2x128xf32, #tpu.memory_space<vmem>>, vector<2x128xf32>,
    return
  }
  func.func @transform_0(%arg0: i32) -> (i32, i32, i32) {
    %c0_i32 = arith.constant 0 : i32
    %c0_i32_0 = arith.constant 0 : i32
    %c0_i32_1 = arith.constant 0 : i32
    %c0_i32_2 = arith.constant 0 : i32
    return %c0_i32, %c0_i32_0, %c0_i32_1 : i32, i32, i32
  }
  func.func @transform_1(%arg0: i32) -> (i32, i32) {
    %c0_i32 = arith.constant 0 : i32
    %c0_i32_0 = arith.constant 0 : i32
    %c0_i32_1 = arith.constant 0 : i32
    return %c0_i32, %c0_i32_0 : i32, i32
  }
  func.func @transform_2(%arg0: i32) -> (i32, i32) {
    %c0_i32 = arith.constant 0 : i32
    %c0_i32_0 = arith.constant 0 : i32
    %c0_i32_1 = arith.constant 0 : i32
    return %c0_i32, %c0_i32_0 : i32, i32
  }
  func.func @transform_3(%arg0: i32) -> (i32, i32) {
    %c0_i32 = arith.constant 0 : i32
    %c0_i32_0 = arith.constant 0 : i32
    %c0_i32_1 = arith.constant 0 : i32
    return %c0_i32, %c0_i32_0 : i32, i32
  }
}

module attributes {stable_mosaic.version = 11 : i64} {
  func.func @conv_bn_relu_kernel(%arg0: i32, %arg1: memref<8x576xbf16, #tpu.memory_space<vmem>>, %arg2: memref<576x128xbf16, #tpu.memory_space<vmem>>, %arg3: memref<1x128xf32, #tpu.memory_space<vmem>>, %arg4: memref<8x128xbf16, #tpu.memory_space<vmem>>) attributes {dimension_semantics = [#tpu.dimension_semantics<parallel>], iteration_bounds = array<i64: 1>, scalar_prefetch = 0 : i64, scratch_operands = 0 : i64, tpu.core_type = #tpu.core_type<tc>, window_params = [{transform_indices = @transform_0, window_bounds = array<i64: 8, 576>}, {pipeline_mode = #tpu.pipeline_mode<synchronous>, transform_indices = @transform_1, window_bounds = array<i64: 576, 128>}, {pipeline_mode = #tpu.pipeline_mode<synchronous>, transform_indices = @transform_2, window_bounds = array<i64: 1, 128>}, {transform_indices = @transform_3, window_bounds = array<i64: 8, 128>}]} {
    %c0 = arith.constant 0 : index
    %c0_0 = arith.constant 0 : index
    %0 = vector.load %arg1[%c0, %c0_0] : memref<8x576xbf16, #tpu.memory_space<vmem>>, vector<8x576xbf16>
    %c0_1 = arith.constant 0 : index
    %c0_2 = arith.constant 0 : index
    %1 = vector.load %arg2[%c0_1, %c0_2] : memref<576x128xbf16, #tpu.memory_space<vmem>>, vector<576x128xbf16>
    %cst = arith.constant dense<0.000000e+00> : vector<8x128xf32>
    %2 = tpu.matmul %0, %1, %cst {dimension_numbers = #tpu.dot_dimension_numbers<[1], [0], [0], [1], [0, 0, 1, 1], [], []>} : vector<8x576xbf16>, vector<576x128xbf16>, vector<8x128xf32> -> vector<8x128xf32>
    %c0_3 = arith.constant 0 : index
    %c0_4 = arith.constant 0 : index
    %3 = vector.load %arg3[%c0_3, %c0_4] : memref<1x128xf32, #tpu.memory_space<vmem>>, vector<1x128xf32>
    %4 = vector.broadcast %3 : vector<1x128xf32> to vector<8x128xf32>
    %5 = arith.addf %2, %4 : vector<8x128xf32>
    %cst_5 = arith.constant 0.000000e+00 : f32
    %6 = vector.broadcast %cst_5 : f32 to vector<8x128xf32>
    %7 = arith.maximumf %5, %6 : vector<8x128xf32>
    %8 = arith.truncf %7 : vector<8x128xf32> to vector<8x128xbf16>
    %c0_6 = arith.constant 0 : index
    %c0_7 = arith.constant 0 : index
    %9 = vector.load %arg4[%c0_6, %c0_7] : memref<8x128xbf16, #tpu.memory_space<vmem>>, vector<8x128xbf16>
    tpu.vector_store %arg4[%c0_6, %c0_7], %8 {strides = array<i32>} : memref<8x128xbf16, #tpu.memory_space<vmem>>, vector<8x128xbf16>,
    return
  }
  func.func @transform_0(%arg0: i32) -> (i32, i32) {
    %c0_i32 = arith.constant 0 : i32
    %c0_i32_0 = arith.constant 0 : i32
    return %arg0, %c0_i32 : i32, i32
  }
  func.func @transform_1(%arg0: i32) -> (i32, i32) {
    %c0_i32 = arith.constant 0 : i32
    %c0_i32_0 = arith.constant 0 : i32
    %c0_i32_1 = arith.constant 0 : i32
    return %c0_i32, %c0_i32_0 : i32, i32
  }
  func.func @transform_2(%arg0: i32) -> (i32, i32) {
    %c0_i32 = arith.constant 0 : i32
    %c0_i32_0 = arith.constant 0 : i32
    %c0_i32_1 = arith.constant 0 : i32
    return %c0_i32, %c0_i32_0 : i32, i32
  }
  func.func @transform_3(%arg0: i32) -> (i32, i32) {
    %c0_i32 = arith.constant 0 : i32
    %c0_i32_0 = arith.constant 0 : i32
    return %arg0, %c0_i32 : i32, i32
  }
}

</mosaic_0001>

<bundles_post_ra>
// kernel: modified_selecsls_forward.4
= control target key start
LH: loop header
LB: loop body
LE: loop exit
PB: predicated region body
PF: predicated region fallthrough
CT: control target
= control target key end

     0   :  { %v581_v0 = vmov 0   ;;  %vm190_vm0 = vcmask 261120   ;;  %s733_s1 = inlined_call_operand.vmem [shape: bf16[160,128], index: 1, kind: input, shape index: {}]   ;;  %s734_s0 = inlined_call_operand.vmem [shape: bf16[128,160], index: 0, kind: input, shape index: {}]   ;;  %s735_s2 = inlined_call_operand.vmem [shape: f32[1,128], index: 2, kind: input, shape index: {}]   ;;  %s736_s3 = inlined_call_operand.vmem [shape: bf16[128,128], index: 3, kind: output, shape index: {}]  }
   0x1   :  { %215 = vmatprep.subr.bf16.mxu0 %v581_v0  ;;  %526 = vmatprep.subr.bf16.mxu1 %v581_v0  ;;  %v547_v1 = vld [vmem:[%s733_s1] sm:$0xff]   ;;  %v548_v2 = vld [vmem:[%s733_s1 + $0x8] sm:$0xff]   ;;  %v549_v3 = vld [vmem:[%s733_s1 + $0x10] sm:$0xff]  }
   0x2   :  { %216 = vmatpush1.bf16.msra.mxu0 %v547_v1  ;;  %536 = vmatpush1.bf16.msra.mxu1 %v547_v1  ;;  %v550_v4 = vld [vmem:[%s733_s1 + $0x18] sm:$0xff]   ;;  %v559_v5 = vld [vmem:[%s734_s0 + $0x4] ss:$8 sps:$4 sm:$0xff]   ;;  %v553_v9 = vld [vmem:[%s733_s1 + $0x30] sm:$0xff]  }
   0x3   :  { %217 = vmatprep.subr.bf16.mxu0 %v581_v0  ;;  %527 = vmatprep.subr.bf16.mxu1 %v581_v0  ;;  %v562_v6 = vld [vmem:[%s734_s0 + $0x44] ss:$8 sps:$4 sm:$0xff]   ;;  %v554_v10 = vld [vmem:[%s733_s1 + $0x38] sm:$0xff]   ;;  %v557_v13 = vld [vmem:[%s734_s0] ss:$8 sps:$4 sm:$0xff]  }
   0x4   :  { %439 = vmatprep.mubr.msk.bf16.mxu0 %vm190_vm0, %v559_v5  ;;  %v551_v7 = vld [vmem:[%s733_s1 + $0x20] sm:$0xff]   ;;  %443 = vmatprep.mubr.msk.bf16.mxu1 %vm190_vm0, %v562_v6  ;;  %v552_v8 = vld [vmem:[%s733_s1 + $0x28] sm:$0xff]   ;;  %v563_v15 = vld [vmem:[%s734_s0 + $0x14] ss:$8 sps:$4 sm:$0xff]  }
   0x5   :  { %v555_v11 = vld [vmem:[%s733_s1 + $0x40] sm:$0xff]   ;;  %v556_v12 = vld [vmem:[%s733_s1 + $0x48] sm:$0xff]   ;;  %v565_v16 = vld [vmem:[%s734_s0 + $0x54] ss:$8 sps:$4 sm:$0xff]  }
   0x6   :  { %218 = vmatpush1.bf16.msra.mxu0 %v548_v2  ;;  %537 = vmatpush1.bf16.msra.mxu1 %v548_v2  ;;  %v560_v14 = vld [vmem:[%s734_s0 + $0x40] ss:$8 sps:$4 sm:$0xff]   ;;  %v567_v17 = vld [vmem:[%s734_s0 + $0x10] ss:$8 sps:$4 sm:$0xff]   ;;  %v569_v19 = vld [vmem:[%s734_s0 + $0x24] ss:$8 sps:$4 sm:$0xff]  }
   0x7   :  { %219 = vmatprep.subr.bf16.mxu0 %v581_v0  ;;  %528 = vmatprep.subr.bf16.mxu1 %v581_v0  ;;  %v568_v18 = vld [vmem:[%s734_s0 + $0x50] ss:$8 sps:$4 sm:$0xff]   ;;  %v571_v20 = vld [vmem:[%s734_s0 + $0x64] ss:$8 sps:$4 sm:$0xff]   ;;  %v573_v21 = vld [vmem:[%s734_s0 + $0x20] ss:$8 sps:$4 sm:$0xff]  }
   0x8   :  { %v574_v22 = vld [vmem:[%s734_s0 + $0x60] ss:$8 sps:$4 sm:$0xff]   ;;  %v575_v23 = vld [vmem:[%s734_s0 + $0x34] ss:$8 sps:$4 sm:$0xff]   ;;  %v579_v25 = vld [vmem:[%s734_s0 + $0x30] ss:$8 sps:$4 sm:$0xff]  }
   0x9   :  { %v577_v24 = vld [vmem:[%s734_s0 + $0x74] ss:$8 sps:$4 sm:$0xff]   ;;  %v580_v26 = vld [vmem:[%s734_s0 + $0x70] ss:$8 sps:$4 sm:$0xff]   ;;  %v691_v27 = vld [vmem:[%s735_s2] ss:$0 sm:$0xff] }
   0xa   :  { %220 = vmatpush1.bf16.msra.mxu0 %v549_v3  ;;  %538 = vmatpush1.bf16.msra.mxu1 %v549_v3 }
   0xb   :  { %221 = vmatprep.subr.bf16.mxu0 %v581_v0  ;;  %529 = vmatprep.subr.bf16.mxu1 %v581_v0 }
   0xe   :  { %222 = vmatpush1.bf16.msra.mxu0 %v550_v4  ;;  %539 = vmatpush1.bf16.msra.mxu1 %v550_v4 }
   0xf   :  { %223 = vmatprep.subr.bf16.mxu0 %v581_v0  ;;  %530 = vmatprep.subr.bf16.mxu1 %v581_v0 }
  0x12   :  { %224 = vmatpush1.bf16.msra.mxu0 %v551_v7  ;;  %540 = vmatpush1.bf16.msra.mxu1 %v551_v7 }
  0x13   :  { %225 = vmatprep.subr.bf16.mxu0 %v581_v0  ;;  %531 = vmatprep.subr.bf16.mxu1 %v581_v0 }
  0x16   :  { %226 = vmatpush1.bf16.msra.mxu0 %v552_v8  ;;  %541 = vmatpush1.bf16.msra.mxu1 %v552_v8 }
  0x17   :  { %227 = vmatprep.subr.bf16.mxu0 %v581_v0  ;;  %532 = vmatprep.subr.bf16.mxu1 %v581_v0 }
  0x1a   :  { %228 = vmatpush1.bf16.msra.mxu0 %v553_v9  ;;  %542 = vmatpush1.bf16.msra.mxu1 %v553_v9 }
  0x1b   :  { %229 = vmatprep.subr.bf16.mxu0 %v581_v0  ;;  %533 = vmatprep.subr.bf16.mxu1 %v581_v0 }
  0x1e   :  { %230 = vmatpush1.bf16.msra.mxu0 %v554_v10  ;;  %543 = vmatpush1.bf16.msra.mxu1 %v554_v10 }
  0x1f   :  { %231 = vmatprep.subr.bf16.mxu0 %v581_v0  ;;  %534 = vmatprep.subr.bf16.mxu1 %v581_v0 }
  0x22   :  { %232 = vmatpush1.bf16.msra.mxu0 %v555_v11  ;;  %544 = vmatpush1.bf16.msra.mxu1 %v555_v11 }
  0x23   :  { %233 = vmatprep.subr.bf16.mxu0 %v581_v0  ;;  %535 = vmatprep.subr.bf16.mxu1 %v581_v0 }
  0x26   :  { %234 = vmatpush1.bf16.msra.mxu0 %v556_v12  ;;  %545 = vmatpush1.bf16.msra.mxu1 %v556_v12 }
  0x29   :  { %248 = vmatmul.mubr.bf16.vlgmr.msra.gmra.mrb[0].mxu0 %v557_v13  ;;  %280 = vmatmul.mubr.bf16.vlgmr.msra.gmra.mrb[0].mxu1 %v560_v14 }
  0x2a   :  { %440 = vmatprep.mubr.msk.bf16.mxu0 %vm190_vm0, %v563_v15  ;;  %444 = vmatprep.mubr.msk.bf16.mxu1 %vm190_vm0, %v565_v16 }
  0x31   :  { %256 = vmatmul.mubr.bf16.gmra.mrb[4].mxu0 %v567_v17  ;;  %288 = vmatmul.mubr.bf16.gmra.mrb[4].mxu1 %v568_v18 }
  0x32   :  { %441 = vmatprep.mubr.msk.bf16.mxu0 %vm190_vm0, %v569_v19  ;;  %445 = vmatprep.mubr.msk.bf16.mxu1 %vm190_vm0, %v571_v20 }
  0x39   :  { %264 = vmatmul.mubr.bf16.gmra.mrb[8].mxu0 %v573_v21  ;;  %296 = vmatmul.mubr.bf16.gmra.mrb[8].mxu1 %v574_v22 }
  0x3a   :  { %442 = vmatprep.mubr.msk.bf16.mxu0 %vm190_vm0, %v575_v23  ;;  %446 = vmatprep.mubr.msk.bf16.mxu1 %vm190_vm0, %v577_v24 }
  0x41   :  { %272 = vmatmul.mubr.bf16.gmra.mrb[12].mxu0 %v579_v25  ;;  %304 = vmatmul.mubr.bf16.gmra.mrb[12].mxu1 %v580_v26 }
  0xfc   :  { %v249_v28 = vpop.f32.mrb[0].mxu0  ;;  %v281_v29 = vpop.f32.mrb[0].mxu1 }
  0xfd   :  { %v250_v30 = vadd.f32 %v691_v27, %v249_v28  ;;  %v282_v31 = vadd.f32 %v691_v27, %v281_v29  ;;  %v251_v32 = vpop.f32.mrb[1].mxu0  ;;  %v283_v33 = vpop.f32.mrb[1].mxu1 }
  0xfe   :  { %v252_v34 = vpop.f32.mrb[2].mxu0  ;;  %v284_v35 = vpop.f32.mrb[2].mxu1 }
  0xff   :  { %v253_v36 = vadd.f32 %v691_v27, %v252_v34  ;;  %v285_v37 = vadd.f32 %v691_v27, %v284_v35  ;;  %v254_v38 = vpop.f32.mrb[3].mxu0  ;;  %v286_v39 = vpop.f32.mrb[3].mxu1  ;;  %v312_v40 = vmax.f32 %v250_v30, 0.0  ;;  %v320_v41 = vmax.f32 %v282_v31, 0.0 }
 0x101   :  { %v313_v42 = vmax.f32 %v253_v36, 0.0  ;;  %v321_v43 = vmax.f32 %v285_v37, 0.0 }
 0x103   :  { %v482_v44 = vpack.c.bf16 %v313_v42, %v312_v40  ;;  %v502_v45 = vpack.c.bf16 %v321_v43, %v320_v41 }
 0x104   :  { %v257_v46 = vpop.f32.mrb[4].mxu0  ;;  %v289_v47 = vpop.f32.mrb[4].mxu1 }
 0x105   :  { %483 = vst [vmem:[%s736_s3] sm:$0xff] %v482_v44   ;;  %522 = vst [vmem:[%s736_s3 + $0x20] sm:$0xff] %v502_v45   ;;  %v258_v48 = vadd.f32 %v691_v27, %v257_v46  ;;  %v290_v49 = vadd.f32 %v691_v27, %v289_v47  ;;  %v259_v50 = vpop.f32.mrb[5].mxu0  ;;  %v291_v51 = vpop.f32.mrb[5].mxu1 }
 0x106   :  { %v260_v52 = vpop.f32.mrb[6].mxu0  ;;  %v292_v53 = vpop.f32.mrb[6].mxu1 }
 0x107   :  { %v261_v54 = vadd.f32 %v691_v27, %v260_v52  ;;  %v293_v55 = vadd.f32 %v691_v27, %v292_v53  ;;  %v262_v56 = vpop.f32.mrb[7].mxu0  ;;  %v294_v57 = vpop.f32.mrb[7].mxu1  ;;  %v314_v58 = vmax.f32 %v258_v48, 0.0  ;;  %v322_v59 = vmax.f32 %v290_v49, 0.0 }
 0x109   :  { %v315_v60 = vmax.f32 %v261_v54, 0.0  ;;  %v323_v61 = vmax.f32 %v293_v55, 0.0 }
 0x10b   :  { %v487_v62 = vpack.c.bf16 %v315_v60, %v314_v58  ;;  %v507_v63 = vpack.c.bf16 %v323_v61, %v322_v59 }
 0x10c   :  { %v265_v0 = vpop.f32.mrb[8].mxu0  ;;  %v297_v1 = vpop.f32.mrb[8].mxu1 }
 0x10d   :  { %519 = vst [vmem:[%s736_s3 + $0x8] sm:$0xff] %v487_v62   ;;  %523 = vst [vmem:[%s736_s3 + $0x28] sm:$0xff] %v507_v63   ;;  %v266_v2 = vadd.f32 %v691_v27, %v265_v0  ;;  %v298_v3 = vadd.f32 %v691_v27, %v297_v1  ;;  %v267_v4 = vpop.f32.mrb[9].mxu0  ;;  %v299_v5 = vpop.f32.mrb[9].mxu1 }
 0x10e   :  { %v268_v6 = vpop.f32.mrb[10].mxu0  ;;  %v300_v7 = vpop.f32.mrb[10].mxu1 }
 0x10f   :  { %v269_v8 = vadd.f32 %v691_v27, %v268_v6  ;;  %v301_v9 = vadd.f32 %v691_v27, %v300_v7  ;;  %v270_v10 = vpop.f32.mrb[11].mxu0  ;;  %v302_v11 = vpop.f32.mrb[11].mxu1  ;;  %v316_v12 = vmax.f32 %v266_v2, 0.0  ;;  %v324_v13 = vmax.f32 %v298_v3, 0.0 }
 0x111   :  { %v317_v14 = vmax.f32 %v269_v8, 0.0  ;;  %v325_v15 = vmax.f32 %v301_v9, 0.0 }
 0x113   :  { %v492_v16 = vpack.c.bf16 %v317_v14, %v316_v12  ;;  %v512_v17 = vpack.c.bf16 %v325_v15, %v324_v13 }
 0x114   :  { %v273_v18 = vpop.f32.mrb[12].mxu0  ;;  %v305_v19 = vpop.f32.mrb[12].mxu1 }
 0x115   :  { %520 = vst [vmem:[%s736_s3 + $0x10] sm:$0xff] %v492_v16   ;;  %524 = vst [vmem:[%s736_s3 + $0x30] sm:$0xff] %v512_v17   ;;  %v274_v20 = vadd.f32 %v691_v27, %v273_v18  ;;  %v306_v21 = vadd.f32 %v691_v27, %v305_v19  ;;  %v275_v22 = vpop.f32.mrb[13].mxu0  ;;  %v307_v23 = vpop.f32.mrb[13].mxu1 }
 0x116   :  { %v276_v24 = vpop.f32.mrb[14].mxu0  ;;  %v308_v25 = vpop.f32.mrb[14].mxu1 }
 0x117   :  { %v277_v26 = vadd.f32 %v691_v27, %v276_v24  ;;  %v309_v28 = vadd.f32 %v691_v27, %v308_v25  ;;  %v278_v29 = vpop.f32.mrb[15].mxu0  ;;  %v310_v30 = vpop.f32.mrb[15].mxu1  ;;  %v318_v31 = vmax.f32 %v274_v20, 0.0  ;;  %v326_v32 = vmax.f32 %v306_v21, 0.0 }
 0x119   :  { %v319_v33 = vmax.f32 %v277_v26, 0.0  ;;  %v327_v34 = vmax.f32 %v309_v28, 0.0 }
 0x11b   :  { %v497_v35 = vpack.c.bf16 %v319_v33, %v318_v31  ;;  %v517_v36 = vpack.c.bf16 %v327_v34, %v326_v32 }
 0x11d   :  { %521 = vst [vmem:[%s736_s3 + $0x18] sm:$0xff] %v497_v35   ;;  %525 = vst [vmem:[%s736_s3 + $0x38] sm:$0xff] %v517_v36  }

// kernel: modified_selecsls_forward.5
= control target key start
LH: loop header
LB: loop body
LE: loop exit
PB: predicated region body
PF: predicated region fallthrough
CT: control target
= control target key end

     0   :  { %vm204_vm0 = vcmask 261120   ;;  %s550_s1 = inlined_call_operand.vmem [shape: bf16[288,128], index: 1, kind: input, shape index: {}]   ;;  %s551_s0 = inlined_call_operand.vmem [shape: bf16[32,288], index: 0, kind: input, shape index: {}]   ;;  %s552_s2 = inlined_call_operand.vmem [shape: f32[1,128], index: 2, kind: input, shape index: {}]   ;;  %s553_s3 = inlined_call_operand.vmem [shape: bf16[32,128], index: 3, kind: output, shape index: {}]  }
   0x1   :  { %v423_v0 = vld [vmem:[%s550_s1 + $0x40] sm:$0xff]   ;;  %v425_v2 = vld [vmem:[%s550_s1 + $0x48] sm:$0xff]   ;;  %v427_v4 = vld [vmem:[%s550_s1 + $0x50] sm:$0xff]  }
   0x2   :  { %v424_v1 = vld [vmem:[%s550_s1] sm:$0xff]   ;;  %383 = vmatprep.subr.bf16.mxu0 %v423_v0  ;;  %v426_v3 = vld [vmem:[%s550_s1 + $0x8] sm:$0xff]   ;;  %v428_v5 = vld [vmem:[%s550_s1 + $0x10] sm:$0xff]  }
   0x3   :  { %384 = vmatpush3.bf16.msra.mxu0 %v424_v1  ;;  %v429_v6 = vld [vmem:[%s550_s1 + $0x58] sm:$0xff]   ;;  %v431_v8 = vld [vmem:[%s550_s1 + $0x60] sm:$0xff]   ;;  %v433_v11 = vld [vmem:[%s550_s1 + $0x68] sm:$0xff]  }
   0x4   :  { %385 = vmatprep.subr.bf16.mxu0 %v425_v2  ;;  %v430_v7 = vld [vmem:[%s550_s1 + $0x18] sm:$0xff]   ;;  %v432_v9 = vld [vmem:[%s550_s1 + $0x20] sm:$0xff]   ;;  %v434_v12 = vld [vmem:[%s550_s1 + $0x28] sm:$0xff]  }
   0x5   :  { %v438_v10 = vld [vmem:[%s550_s1 + $0x80] sm:$0xff]   ;;  %v435_v13 = vld [vmem:[%s550_s1 + $0x70] sm:$0xff]   ;;  %v443_v15 = vld [vmem:[%s550_s1 + $0x88] sm:$0xff]  }
   0x6   :  { %415 = vmatprep.subr.bf16.mxu1 %v438_v10  ;;  %v442_v14 = vld [vmem:[%s551_s0 + $0x4] ss:$12 sps:$4 sm:$0xff]   ;;  %v444_v16 = vld [vmem:[%s551_s0 + $0x8] ss:$12 sps:$4 sm:$0xff]   ;;  %v445_v17 = vld [vmem:[%s551_s0 + $0x20] ss:$12 sps:$4 sm:$0xff]  }
   0x7   :  { %386 = vmatpush3.bf16.msra.mxu0 %v426_v3  ;;  %416 = vmatpush3.bf16.msra.mxu1 %v438_v10  ;;  %v436_v18 = vld [vmem:[%s550_s1 + $0x30] sm:$0xff]   ;;  %v437_v19 = vld [vmem:[%s550_s1 + $0x78] sm:$0xff]   ;;  %v440_v21 = vld [vmem:[%s551_s0] ss:$12 sps:$4 sm:$0xff]  }
   0x8   :  { %387 = vmatprep.subr.bf16.mxu0 %v427_v4  ;;  %243 = vmatprep.mubr.bf16.mxu0 %v442_v14  ;;  %v439_v20 = vld [vmem:[%s550_s1 + $0x38] sm:$0xff]   ;;  %v337_v30 = vld [vmem:[%s552_s2] ss:$0 sm:$0xff] }
   0x9   :  { %417 = vmatprep.subr.bf16.mxu1 %v443_v15  ;;  %419 = vmatprep.mubr.msk.bf16.mxu1 %vm204_vm0, %v444_v16  ;;  %v446_v22 = vld [vmem:[%s551_s0 + $0x1c] ss:$12 sps:$4 sm:$0xff]   ;;  %v448_v23 = vld [vmem:[%s551_s0 + $0x18] ss:$12 sps:$4 sm:$0xff]  }
   0xb   :  { %388 = vmatpush3.bf16.msra.mxu0 %v428_v5  ;;  %418 = vmatpush3.bf16.msra.mxu1 %v443_v15 }
   0xc   :  { %389 = vmatprep.subr.bf16.mxu0 %v429_v6 }
   0xe   :  { %420 = vmatmul.mubr.msk.bf16.vlgmr.msra.gmra.mrb[0].mxu1 %vm204_vm0, %v445_v17 }
   0xf   :  { %390 = vmatpush3.bf16.msra.mxu0 %v430_v7 }
  0x10   :  { %391 = vmatprep.subr.bf16.mxu0 %v431_v8 }
  0x13   :  { %392 = vmatpush3.bf16.msra.mxu0 %v432_v9 }
  0x14   :  { %393 = vmatprep.subr.bf16.mxu0 %v433_v11 }
  0x17   :  { %394 = vmatpush3.bf16.msra.mxu0 %v434_v12 }
  0x18   :  { %395 = vmatprep.subr.bf16.mxu0 %v435_v13 }
  0x1b   :  { %396 = vmatpush3.bf16.msra.mxu0 %v436_v18 }
  0x1c   :  { %397 = vmatprep.subr.bf16.mxu0 %v437_v19 }
  0x1f   :  { %398 = vmatpush3.bf16.msra.mxu0 %v439_v20 }
  0x22   :  { %244 = vmatmul.mubr.bf16.vlgmr.msra.gmra.mrb[0].mxu0 %v440_v21 }
  0x23   :  { %251 = vmatprep.mubr.bf16.mxu0 %v446_v22 }
  0x2a   :  { %252 = vmatmul.mubr.bf16.gmra.mrb[4].mxu0 %v448_v23 }
  0xe1   :  { %v421_v24 = vpop.f32.mrb[0].mxu1 }
  0xe2   :  { %v294_v25 = vpop.f32.mrb[1].mxu1 }
  0xe3   :  { %v422_v26 = vpop.f32.mrb[2].mxu1 }
  0xe4   :  { %v297_v27 = vpop.f32.mrb[3].mxu1 }
  0xf5   :  { %v399_v28 = vpop.f32.mrb[0].mxu0 }
  0xf6   :  { %v400_v29 = vpop.f32.mrb[1].mxu0 }
  0xf7   :  { %v401_v31 = vadd.f32 %v400_v29, %v399_v28  ;;  %v402_v32 = vpop.f32.mrb[2].mxu0 }
  0xf8   :  { %v403_v33 = vpop.f32.mrb[3].mxu0 }
  0xf9   :  { %v404_v34 = vadd.f32 %v403_v33, %v402_v32  ;;  %v246_v35 = vadd.f32 %v401_v31, %v337_v30 }
  0xfb   :  { %v295_v36 = vadd.f32 %v294_v25, %v246_v35  ;;  %v249_v37 = vadd.f32 %v404_v34, %v337_v30 }
  0xfd   :  { %v298_v38 = vadd.f32 %v297_v27, %v249_v37  ;;  %v405_v39 = vpop.f32.mrb[4].mxu0  ;;  %v309_v41 = vmax.f32 %v295_v36, 0.0 }
  0xfe   :  { %v406_v40 = vpop.f32.mrb[5].mxu0 }
  0xff   :  { %v310_v42 = vmax.f32 %v298_v38, 0.0  ;;  %v407_v43 = vadd.f32 %v406_v40, %v405_v39  ;;  %v408_v44 = vpop.f32.mrb[6].mxu0 }
 0x100   :  { %v409_v45 = vpop.f32.mrb[7].mxu0 }
 0x101   :  { %v375_v46 = vpack.c.bf16 %v310_v42, %v309_v41  ;;  %v254_v47 = vadd.f32 %v407_v43, %v337_v30  ;;  %v410_v48 = vadd.f32 %v409_v45, %v408_v44 }
 0x103   :  { %376 = vst [vmem:[%s553_s3] sm:$0xff] %v375_v46   ;;  %v303_v49 = vadd.f32 %v421_v24, %v254_v47  ;;  %v257_v50 = vadd.f32 %v410_v48, %v337_v30 }
 0x105   :  { %v306_v51 = vadd.f32 %v422_v26, %v257_v50  ;;  %v311_v52 = vmax.f32 %v303_v49, 0.0 }
 0x107   :  { %v312_v53 = vmax.f32 %v306_v51, 0.0 }
 0x109   :  { %v380_v54 = vpack.c.bf16 %v312_v53, %v311_v52 }
 0x10b   :  { %382 = vst [vmem:[%s553_s3 + $0x8] sm:$0xff] %v380_v54  }

// kernel: modified_selecsls_forward.7
= control target key start
LH: loop header
LB: loop body
LE: loop exit
PB: predicated region body
PF: predicated region fallthrough
CT: control target
= control target key end

     0   :  { %v211_v0 = vmov 0.0   ;;  %vm212_vm0 = vmmov 0   ;;  %vm19_vm1 = vcmask 1043456   ;;  %vm66_vm2 = vcmask 1041409   ;;  %s269_s1 = inlined_call_operand.vmem [shape: bf16[128,128], index: 1, kind: input, shape index: {}]   ;;  %s270_s0 = inlined_call_operand.vmem [shape: bf16[2,4,128], index: 0, kind: input, shape index: {}]   ;;  %s271_s2 = inlined_call_operand.vmem [shape: f32[1,128], index: 2, kind: input, shape index: {}]   ;;  %s272_s3 = inlined_call_operand.vmem [shape: f32[2,128], index: 3, kind: output, shape index: {}]  }
   0x1   :  { %181 = vmatprep.subr.bf16.mxu0 %v211_v0  ;;  %v203_v1 = vld [vmem:[%s269_s1] sm:$0xff]   ;;  %197 = vmatprep.mubr.msk.bf16.mxu0 %vm212_vm0, %v211_v0  ;;  %v204_v2 = vld [vmem:[%s269_s1 + $0x8] sm:$0xff]   ;;  %v205_v3 = vld [vmem:[%s269_s1 + $0x10] sm:$0xff]  }
   0x2   :  { %182 = vmatpush3.bf16.msra.mxu0 %v203_v1  ;;  %v15_v4 = vld [vmem:[%s270_s0] sm:$0x3]  ;;  %v16_v5 = vld [vmem:[%s270_s0 + $0x2] sm:$0x3]  ;;  %v206_v8 = vld [vmem:[%s269_s1 + $0x18] sm:$0xff]  }
   0x3   :  { %183 = vmatprep.subr.bf16.mxu0 %v211_v0  ;;  %v17_v6 = vunpack.c.l.bf16 %v15_v4  ;;  %v18_v7 = vunpack.c.l.bf16 %v16_v5  ;;  %v207_v13 = vld [vmem:[%s269_s1 + $0x20] sm:$0xff]   ;;  %v208_v18 = vld [vmem:[%s269_s1 + $0x28] sm:$0xff]   ;;  %v209_v23 = vld [vmem:[%s269_s1 + $0x30] sm:$0xff]  }
   0x4   :  { %v210_v28 = vld [vmem:[%s269_s1 + $0x38] sm:$0xff]   ;;  %v163_v35 = vld [vmem:[%s271_s2] ss:$0 sm:$0xff] }
   0x5   :  { %v20_v9 = vsel %vm19_vm1, %v17_v6, 0.0  ;;  %v27_v10 = vsel %vm19_vm1, %v18_v7, 0.0 }
   0x6   :  { %184 = vmatpush3.bf16.msra.mxu0 %v204_v2  ;;  %v21_v11 = vrot.slane %v20_v9, 4  ;;  %v28_v12 = vrot.slane %v27_v10, 4 }
   0x7   :  { %185 = vmatprep.subr.bf16.mxu0 %v211_v0 }
   0x8   :  { %v22_v14 = vadd.f32 %v21_v11, %v20_v9  ;;  %v29_v15 = vadd.f32 %v28_v12, %v27_v10 }
   0xa   :  { %186 = vmatpush3.bf16.msra.mxu0 %v205_v3  ;;  %v23_v16 = vrot.slane %v22_v14, 2  ;;  %v30_v17 = vrot.slane %v29_v15, 2 }
   0xb   :  { %187 = vmatprep.subr.bf16.mxu0 %v211_v0 }
   0xc   :  { %v24_v19 = vadd.f32 %v23_v16, %v22_v14  ;;  %v31_v20 = vadd.f32 %v30_v17, %v29_v15 }
   0xe   :  { %188 = vmatpush3.bf16.msra.mxu0 %v206_v8  ;;  %v25_v21 = vrot.slane %v24_v19, 1  ;;  %v32_v22 = vrot.slane %v31_v20, 1 }
   0xf   :  { %189 = vmatprep.subr.bf16.mxu0 %v211_v0 }
  0x10   :  { %v26_v24 = vadd.f32 %v25_v21, %v24_v19  ;;  %v33_v25 = vadd.f32 %v32_v22, %v31_v20 }
  0x12   :  { %190 = vmatpush3.bf16.msra.mxu0 %v207_v13  ;;  %v35_v26 = vmul.f32 0.25, %v26_v24  ;;  %v36_v27 = vmul.f32 0.25, %v33_v25 }
  0x13   :  { %191 = vmatprep.subr.bf16.mxu0 %v211_v0 }
  0x14   :  { %v37_v29 = vpack.c.bf16 %v35_v26, %v35_v26  ;;  %v38_v30 = vpack.c.bf16 %v36_v27, %v36_v27 }
  0x16   :  { %192 = vmatpush3.bf16.msra.mxu0 %v208_v18  ;;  %v64_v31 = vunpack.c.l.b16 %v37_v29  ;;  %v65_v32 = vunpack.c.l.b16 %v38_v30 }
  0x17   :  { %193 = vmatprep.subr.bf16.mxu0 %v211_v0 }
  0x18   :  { %v67_v33 = vsel %vm66_vm2, %v65_v32, %v64_v31 }
  0x19   :  { %v68_v34 = vpack.c.b16 %v67_v33, %v67_v33 }
  0x1a   :  { %194 = vmatpush3.bf16.msra.mxu0 %v209_v23 }
  0x1b   :  { %195 = vmatprep.subr.bf16.mxu0 %v211_v0 }
  0x1e   :  { %196 = vmatpush3.bf16.msra.mxu0 %v210_v28 }
  0x21   :  { %198 = vmatmul.mubr.bf16.vlgmr.msra.gmra.mrb[0].mxu0 %v68_v34 }
  0xf4   :  { %v152_v36 = vpop.f32.mrb[0].mxu0 }
  0xf5   :  { %v153_v37 = vadd.f32 %v163_v35, %v152_v36  ;;  %v199_v38 = vpop.f32.mrb[1].mxu0 }
  0xf6   :  { %v155_v39 = vpop.f32.mrb[2].mxu0 }
  0xf7   :  { %158 = vst [vmem:[%s272_s3] sm:$0x3] %v153_v37  ;;  %v200_v40 = vpop.f32.mrb[3].mxu0 }

// kernel: modified_selecsls_forward.6
= control target key start
LH: loop header
LB: loop body
LE: loop exit
PB: predicated region body
PF: predicated region fallthrough
CT: control target
= control target key end

     0   :  { %v608_v35 = vmov 0.0   ;;  %vm609_vm0 = vmmov 0   ;;  %vm330_vm1 = vcmask 523264   ;;  %s753_s1 = inlined_call_operand.vmem [shape: bf16[576,128], index: 1, kind: input, shape index: {}]   ;;  %s754_s0 = inlined_call_operand.vmem [shape: bf16[8,576], index: 0, kind: input, shape index: {}]   ;;  %s755_s2 = inlined_call_operand.vmem [shape: f32[1,128], index: 2, kind: input, shape index: {}]   ;;  %s756_s3 = inlined_call_operand.vmem [shape: bf16[8,128], index: 3, kind: output, shape index: {}]  }
   0x1   :  { %v567_v0 = vld [vmem:[%s753_s1 + $0x40] sm:$0xff]   ;;  %v571_v4 = vld [vmem:[%s753_s1 + $0x48] sm:$0xff]   ;;  %v575_v8 = vld [vmem:[%s753_s1 + $0x50] sm:$0xff]  }
   0x2   :  { %v568_v1 = vld [vmem:[%s753_s1] sm:$0xff]   ;;  %504 = vmatprep.subr.bf16.mxu0 %v567_v0  ;;  %v572_v5 = vld [vmem:[%s753_s1 + $0x8] sm:$0xff]   ;;  %v576_v9 = vld [vmem:[%s753_s1 + $0x10] sm:$0xff]  }
   0x3   :  { %v569_v2 = vld [vmem:[%s753_s1 + $0xc0] sm:$0xff]   ;;  %505 = vmatpush3.bf16.msra.mxu0 %v568_v1  ;;  %v573_v6 = vld [vmem:[%s753_s1 + $0xc8] sm:$0xff]   ;;  %v577_v10 = vld [vmem:[%s753_s1 + $0xd0] sm:$0xff]  }
   0x4   :  { %v570_v3 = vld [vmem:[%s753_s1 + $0x80] sm:$0xff]   ;;  %526 = vmatprep.subr.bf16.mxu1 %v569_v2  ;;  %506 = vmatprep.subr.bf16.mxu0 %v571_v4  ;;  %v574_v7 = vld [vmem:[%s753_s1 + $0x88] sm:$0xff]   ;;  %v578_v11 = vld [vmem:[%s753_s1 + $0x90] sm:$0xff]  }
   0x5   :  { %527 = vmatpush3.bf16.msra.mxu1 %v570_v3  ;;  %v579_v12 = vld [vmem:[%s753_s1 + $0x58] sm:$0xff]   ;;  %v583_v16 = vld [vmem:[%s753_s1 + $0x60] sm:$0xff]   ;;  %v587_v20 = vld [vmem:[%s753_s1 + $0x68] sm:$0xff]  }
   0x6   :  { %528 = vmatprep.subr.bf16.mxu1 %v573_v6  ;;  %v580_v13 = vld [vmem:[%s753_s1 + $0x18] sm:$0xff]   ;;  %v584_v17 = vld [vmem:[%s753_s1 + $0x20] sm:$0xff]   ;;  %v588_v21 = vld [vmem:[%s753_s1 + $0x28] sm:$0xff]  }
   0x7   :  { %507 = vmatpush3.bf16.msra.mxu0 %v572_v5  ;;  %v581_v14 = vld [vmem:[%s753_s1 + $0xd8] sm:$0xff]   ;;  %v585_v18 = vld [vmem:[%s753_s1 + $0xe0] sm:$0xff]   ;;  %v589_v22 = vld [vmem:[%s753_s1 + $0xe8] sm:$0xff]  }
   0x8   :  { %508 = vmatprep.subr.bf16.mxu0 %v575_v8  ;;  %v582_v15 = vld [vmem:[%s753_s1 + $0x98] sm:$0xff]   ;;  %v586_v19 = vld [vmem:[%s753_s1 + $0xa0] sm:$0xff]   ;;  %v590_v23 = vld [vmem:[%s753_s1 + $0xa8] sm:$0xff]  }
   0x9   :  { %529 = vmatpush3.bf16.msra.mxu1 %v574_v7  ;;  %v591_v24 = vld [vmem:[%s753_s1 + $0x70] sm:$0xff]   ;;  %v595_v28 = vld [vmem:[%s753_s1 + $0x78] sm:$0xff]   ;;  %v15_v31 = vld [vmem:[%s754_s0] sm:$0xff] }
   0xa   :  { %530 = vmatprep.subr.bf16.mxu1 %v577_v10  ;;  %v592_v25 = vld [vmem:[%s753_s1 + $0x30] sm:$0xff]   ;;  %v596_v29 = vld [vmem:[%s753_s1 + $0x38] sm:$0xff]   ;;  %v462_v32 = vcombine.low %v15_v31, %v15_v31  ;;  %v463_v33 = vcombine.high %v15_v31, %v15_v31  ;;  %v16_v36 = vld [vmem:[%s754_s0 + $0x8] sm:$0xff] }
   0xb   :  { %509 = vmatpush3.bf16.msra.mxu0 %v576_v9  ;;  %v593_v26 = vld [vmem:[%s753_s1 + $0xf0] sm:$0xff]   ;;  %v597_v30 = vld [vmem:[%s753_s1 + $0xf8] sm:$0xff]   ;;  %v464_v37 = vcombine.low %v16_v36, %v16_v36  ;;  %v465_v38 = vcombine.high %v16_v36, %v16_v36  ;;  %v604_v39 = vld [vmem:[%s753_s1 + $0x100] sm:$0xff]  }
   0xc   :  { %510 = vmatprep.subr.bf16.mxu0 %v579_v12  ;;  %v594_v27 = vld [vmem:[%s753_s1 + $0xb0] sm:$0xff]   ;;  %v601_v34 = vld [vmem:[%s753_s1 + $0xb8] sm:$0xff]   ;;  %366 = vmatprep.mubr.bf16.mxu0 %v463_v33  ;;  %v605_v40 = vld [vmem:[%s753_s1 + $0x108] sm:$0xff]  }
   0xd   :  { %531 = vmatpush3.bf16.msra.mxu1 %v578_v11  ;;  %406 = vmatprep.mubr.bf16.mxu1 %v465_v38  ;;  %v606_v41 = vld [vmem:[%s753_s1 + $0x110] sm:$0xff]   ;;  %v607_v42 = vld [vmem:[%s753_s1 + $0x118] sm:$0xff]   ;;  %v461_v45 = vld [vmem:[%s755_s2] ss:$0 sm:$0xff] }
   0xe   :  { %532 = vmatprep.subr.bf16.mxu1 %v581_v14  ;;  %v600_v43 = vld [vmem:[%s754_s0 + $0x10] ss:$0 sps:$4 sm:$0xff]  }
   0xf   :  { %511 = vmatpush3.bf16.msra.mxu0 %v580_v13 }
  0x10   :  { %512 = vmatprep.subr.bf16.mxu0 %v583_v16 }
  0x11   :  { %533 = vmatpush3.bf16.msra.mxu1 %v582_v15 }
  0x12   :  { %534 = vmatprep.subr.bf16.mxu1 %v585_v18 }
  0x13   :  { %513 = vmatpush3.bf16.msra.mxu0 %v584_v17 }
  0x14   :  { %514 = vmatprep.subr.bf16.mxu0 %v587_v20 }
  0x15   :  { %535 = vmatpush3.bf16.msra.mxu1 %v586_v19 }
  0x16   :  { %536 = vmatprep.subr.bf16.mxu1 %v589_v22 }
  0x17   :  { %515 = vmatpush3.bf16.msra.mxu0 %v588_v21 }
  0x18   :  { %516 = vmatprep.subr.bf16.mxu0 %v591_v24 }
  0x19   :  { %537 = vmatpush3.bf16.msra.mxu1 %v590_v23 }
  0x1a   :  { %538 = vmatprep.subr.bf16.mxu1 %v593_v26 }
  0x1b   :  { %517 = vmatpush3.bf16.msra.mxu0 %v592_v25 }
  0x1c   :  { %518 = vmatprep.subr.bf16.mxu0 %v595_v28 }
  0x1d   :  { %539 = vmatpush3.bf16.msra.mxu1 %v594_v27 }
  0x1e   :  { %540 = vmatprep.subr.bf16.mxu1 %v597_v30 }
  0x1f   :  { %519 = vmatpush3.bf16.msra.mxu0 %v596_v29 }
  0x20   :  { %553 = vmatprep.subr.bf16.mxu0 %v608_v35 }
  0x21   :  { %541 = vmatpush3.bf16.msra.mxu1 %v601_v34 }
  0x22   :  { %367 = vmatmul.mubr.bf16.vlgmr.msra.gmra.mrb[0].mxu0 %v462_v32 }
  0x23   :  { %554 = vmatpush3.bf16.msra.mxu0 %v604_v39  ;;  %561 = vmatprep.mubr.msk.bf16.mxu0 %vm609_vm0, %v608_v35 }
  0x24   :  { %407 = vmatmul.mubr.bf16.vlgmr.msra.gmra.mrb[0].mxu1 %v464_v37  ;;  %555 = vmatprep.subr.bf16.mxu0 %v608_v35 }
  0x27   :  { %556 = vmatpush3.bf16.msra.mxu0 %v605_v40 }
  0x28   :  { %557 = vmatprep.subr.bf16.mxu0 %v608_v35 }
  0x2b   :  { %558 = vmatpush3.bf16.msra.mxu0 %v606_v41 }
  0x2c   :  { %559 = vmatprep.subr.bf16.mxu0 %v608_v35 }
  0x2f   :  { %560 = vmatpush3.bf16.msra.mxu0 %v607_v42 }
  0x32   :  { %562 = vmatmul.mubr.msk.bf16.vlgmr.msra.gmra.mrb[4].mxu0 %vm330_vm1, %v600_v43 }
  0xf5   :  { %v520_v44 = vpop.f32.mrb[0].mxu0 }
  0xf6   :  { %v521_v46 = vpop.f32.mrb[1].mxu0 }
  0xf7   :  { %v522_v47 = vadd.f32 %v521_v46, %v520_v44  ;;  %v523_v48 = vpop.f32.mrb[2].mxu0  ;;  %v542_v49 = vpop.f32.mrb[0].mxu1 }
  0xf8   :  { %v524_v50 = vpop.f32.mrb[3].mxu0  ;;  %v543_v51 = vpop.f32.mrb[1].mxu1 }
  0xf9   :  { %v369_v52 = vadd.f32 %v522_v47, %v461_v45  ;;  %v544_v53 = vadd.f32 %v543_v51, %v542_v49  ;;  %v545_v54 = vpop.f32.mrb[2].mxu1 }
  0xfa   :  { %v546_v55 = vpop.f32.mrb[3].mxu1 }
  0xfb   :  { %v409_v56 = vadd.f32 %v544_v53, %v369_v52 }
 0x105   :  { %v448_v57 = vpop.f32.mrb[4].mxu0 }
 0x106   :  { %v449_v58 = vadd.f32 %v448_v57, %v409_v56  ;;  %v563_v59 = vpop.f32.mrb[5].mxu0 }
 0x107   :  { %v451_v60 = vpop.f32.mrb[6].mxu0 }
 0x108   :  { %v454_v61 = vmax.f32 %v449_v58, 0.0  ;;  %v564_v62 = vpop.f32.mrb[7].mxu0 }
 0x10a   :  { %v455_v63 = vpack.c.bf16 %v454_v61, %v454_v61 }
 0x10c   :  { %456 = vst [vmem:[%s756_s3] sm:$0xf] %v455_v63 }

</bundles_post_ra>
